<compile_context>
chip_gen: v5e
topology: v5e:2x2
jax: 0.10.0
libtpu: 0.0.40
codegen_flags: <defaults>
</compile_context>

<pallas_src>
import numpy as np
import jax
import jax.numpy as jnp
from jax.experimental import pallas as pl
from jax.experimental.pallas import tpu as pltpu

# ----------------------------- module constants -----------------------------
C_1 = 0.001
C_2 = 0.008
M = 1000                       # number of iDDPM timesteps
IMG_RES = 16
IMG_CH = 4
MODEL_OUT_CH = 2 * IMG_CH      # iDDPM model predicts mean + var -> 2*C channels


def build_u_table():
    """u[j] buffer from iDDPMPrecond.__init__ (computed on host, float32)."""
    def alpha_bar(j):
        return np.sin(0.5 * np.pi * j / M / (C_2 + 1.0)) ** 2

    u = np.zeros(M + 1, dtype=np.float64)
    for j in range(M, 0, -1):
        ratio = max(alpha_bar(j - 1) / alpha_bar(j), C_1)
        u[j - 1] = np.sqrt((u[j] ** 2 + 1.0) / ratio - 1.0)
    return u.astype(np.float32)


# --------------------------------- kernel -----------------------------------
def iddpm_precond_kernel(x_ref, a_ref, bias_ref, out_ref):
    # x_ref:    VMEM (B*C, HW)   f32  packed input (sublane/lane dense)
    # a_ref:    VMEM (B*C, B*C)  f32  block-diagonal mix, pre-scaled by c_out*c_in
    # bias_ref: VMEM (B*C, 1)    f32  per-row bias, pre-scaled by c_out*c_noise/M
    # out_ref:  VMEM (B*C, HW)   f32
    bc, hw = x_ref.shape
    x = x_ref[...]
    a = a_ref[...]
    # D_x = c_skip * x + c_out * F_x[:, :img_channels]  with all scalars
    # pre-folded into `a` and `bias`; start the accumulator at x + bias so the
    # skip connection costs nothing extra.
    acc = x + bias_ref[...]                      # (bc,1) broadcasts over lanes
    # Tiny contraction unrolled as broadcast-FMA passes on the VPU (no MXU).
    for j in range(bc):
        acc = acc + a[:, j:j + 1] * x[j:j + 1, :]
    out_ref[...] = acc


# -------------------------------- wrapper ------------------------------------
def iddpm_precond(x_nchw, sigma, u_table, w_mix, noise_w):
    B, C, H, W = x_nchw.shape
    HW = H * W
    x_packed = x_nchw.astype(jnp.float32).reshape(B * C, HW)

    # ---- hoisted preconditioning scalars (cheap XLA, once per call) ----
    sigma = sigma.astype(jnp.float32).reshape(B)
    c_in = 1.0 / jnp.sqrt(sigma * sigma + 1.0)                     # (B,)
    c_out = -sigma                                                 # (B,)
    # round_sigma(sigma, return_index=True): argmin_j |sigma - u_j|
    idx = jnp.argmin(jnp.abs(sigma[:, None] - u_table[None, :]), axis=1)
    c_noise = jnp.float32(M - 1) - idx.astype(jnp.float32)         # (B,)
    # c_skip = 1 (handled by the accumulator init inside the kernel)

    # Only the mean head (first C rows of the 2C-channel output) is consumed.
    w_used = w_mix[:C, :].astype(jnp.float32)                      # (C, C)
    nw_used = noise_w[:C, 0].astype(jnp.float32)                   # (C,)

    # Block-diagonal channel mix pre-scaled by c_out*c_in:
    #   A[b*C + r, b*C + k] = c_out[b] * c_in[b] * W[r, k]
    scale = c_out * c_in                                           # (B,)
    blocks = scale[:, None, None] * w_used[None, :, :]             # (B, C, C)
    eye_b = jnp.eye(B, dtype=jnp.float32)
    a_bd = (eye_b[:, None, :, None] * blocks[:, :, None, :]
            ).reshape(B * C, B * C)

    # Per-row bias: c_out[b] * nw[r] * c_noise[b] / M
    bias = ((c_out * c_noise / jnp.float32(M))[:, None] * nw_used[None, :]
            ).reshape(B * C, 1)

    out = pl.pallas_call(
        iddpm_precond_kernel,
        out_shape=jax.ShapeDtypeStruct((B * C, HW), jnp.float32),
        in_specs=[
            pl.BlockSpec(memory_space=pltpu.MemorySpace.VMEM),     # x packed
            pl.BlockSpec(memory_space=pltpu.MemorySpace.VMEM),     # A block-diag
            pl.BlockSpec(memory_space=pltpu.MemorySpace.VMEM),     # bias column
        ],
        out_specs=pl.BlockSpec(memory_space=pltpu.MemorySpace.VMEM),
    )(x_packed, a_bd, bias)
    return out.reshape(B, C, H, W)


# ------------------------------ JAX reference --------------------------------
def iddpm_precond_ref(x, sigma, u_table, w_mix, noise_w):
    B, C, H, W = x.shape
    sigma_r = sigma.reshape(-1, 1, 1, 1)
    c_in = 1.0 / jnp.sqrt(sigma_r ** 2 + 1.0)
    c_out = -sigma_r
    dist = jnp.abs(sigma.reshape(-1, 1) - u_table.reshape(1, -1))
    idx = jnp.argmin(dist, axis=1).astype(jnp.float32)
    c_noise = (M - 1) - idx
    x_in = (c_in * x).reshape(B, C, H * W)
    f = jnp.einsum("oc,bcl->bol", w_mix, x_in)
    f = f + noise_w.reshape(1, -1, 1) * (c_noise.reshape(-1, 1, 1) / M)
    d = x.reshape(B, C, H * W) + c_out.reshape(-1, 1, 1) * f[:, :C, :]
    return d.reshape(B, C, H, W)


# ---------------------------------- main --------------------------------------
if __name__ == "__main__":
    key = jax.random.PRNGKey(0)
    kx, ks, kw, kn = jax.random.split(key, 4)

    u_np = build_u_table()
    u_table = jnp.asarray(u_np)
    sigma_min, sigma_max = float(u_np[M - 1]), float(u_np[0])

    B = 2
    x = jax.random.normal(kx, (B, IMG_CH, IMG_RES, IMG_RES), dtype=jnp.float32)
    sigma = jax.random.uniform(ks, (B,), dtype=jnp.float32,
                               minval=max(sigma_min, 0.5),
                               maxval=min(sigma_max, 5.0))

    # deterministic stand-in model parameters
    w_mix = (jax.random.normal(kw, (MODEL_OUT_CH, IMG_CH), dtype=jnp.float32)
             * 0.1)
    noise_w = (jax.random.normal(kn, (MODEL_OUT_CH, 1), dtype=jnp.float32)
               * 0.1)

    d_x = jax.block_until_ready(iddpm_precond(x, sigma, u_table, w_mix, noise_w))
    d_ref = iddpm_precond_ref(x, sigma, u_table, w_mix, noise_w)

    # Scalar folding (c_out*c_in into W, c_out*c_noise/M into the bias) changes
    # rounding order slightly vs. the unfused reference -> slightly looser tol.
    np.testing.assert_allclose(np.asarray(d_x), np.asarray(d_ref),
                               rtol=1e-4, atol=1e-5)
    print("KERNEL_OK")
</pallas_src>

<mosaic_0001>
module attributes {stable_mosaic.version = 11 : i64} {
  func.func @iddpm_precond_kernel(%arg0: memref<8x256xf32, #tpu.memory_space<vmem>>, %arg1: memref<8x8xf32, #tpu.memory_space<vmem>>, %arg2: memref<8x1xf32, #tpu.memory_space<vmem>>, %arg3: memref<8x256xf32, #tpu.memory_space<vmem>>) attributes {dimension_semantics = [], scalar_prefetch = 0 : i64, scratch_operands = 0 : i64, tpu.core_type = #tpu.core_type<tc>} {
    %c0 = arith.constant 0 : index
    %c0_0 = arith.constant 0 : index
    %0 = vector.load %arg0[%c0, %c0_0] : memref<8x256xf32, #tpu.memory_space<vmem>>, vector<8x256xf32>
    %c0_1 = arith.constant 0 : index
    %c0_2 = arith.constant 0 : index
    %1 = vector.load %arg1[%c0_1, %c0_2] : memref<8x8xf32, #tpu.memory_space<vmem>>, vector<8x8xf32>
    %c0_3 = arith.constant 0 : index
    %c0_4 = arith.constant 0 : index
    %2 = vector.load %arg2[%c0_3, %c0_4] : memref<8x1xf32, #tpu.memory_space<vmem>>, vector<8x1xf32>
    %3 = vector.broadcast %2 : vector<8x1xf32> to vector<8x256xf32>
    %4 = arith.addf %0, %3 : vector<8x256xf32>
    %5 = vector.extract_strided_slice %1 {offsets = [0, 0], sizes = [8, 1], strides = [1, 1]} : vector<8x8xf32> to vector<8x1xf32>
    %6 = vector.extract_strided_slice %0 {offsets = [0, 0], sizes = [1, 256], strides = [1, 1]} : vector<8x256xf32> to vector<1x256xf32>
    %7 = vector.broadcast %5 : vector<8x1xf32> to vector<8x256xf32>
    %8 = vector.broadcast %6 : vector<1x256xf32> to vector<8x256xf32>
    %9 = arith.mulf %7, %8 : vector<8x256xf32>
    %10 = arith.addf %4, %9 : vector<8x256xf32>
    %11 = vector.extract_strided_slice %1 {offsets = [0, 1], sizes = [8, 1], strides = [1, 1]} : vector<8x8xf32> to vector<8x1xf32>
    %12 = vector.extract_strided_slice %0 {offsets = [1, 0], sizes = [1, 256], strides = [1, 1]} : vector<8x256xf32> to vector<1x256xf32>
    %13 = vector.broadcast %11 : vector<8x1xf32> to vector<8x256xf32>
    %14 = vector.broadcast %12 : vector<1x256xf32> to vector<8x256xf32>
    %15 = arith.mulf %13, %14 : vector<8x256xf32>
    %16 = arith.addf %10, %15 : vector<8x256xf32>
    %17 = vector.extract_strided_slice %1 {offsets = [0, 2], sizes = [8, 1], strides = [1, 1]} : vector<8x8xf32> to vector<8x1xf32>
    %18 = vector.extract_strided_slice %0 {offsets = [2, 0], sizes = [1, 256], strides = [1, 1]} : vector<8x256xf32> to vector<1x256xf32>
    %19 = vector.broadcast %17 : vector<8x1xf32> to vector<8x256xf32>
    %20 = vector.broadcast %18 : vector<1x256xf32> to vector<8x256xf32>
    %21 = arith.mulf %19, %20 : vector<8x256xf32>
    %22 = arith.addf %16, %21 : vector<8x256xf32>
    %23 = vector.extract_strided_slice %1 {offsets = [0, 3], sizes = [8, 1], strides = [1, 1]} : vector<8x8xf32> to vector<8x1xf32>
    %24 = vector.extract_strided_slice %0 {offsets = [3, 0], sizes = [1, 256], strides = [1, 1]} : vector<8x256xf32> to vector<1x256xf32>
    %25 = vector.broadcast %23 : vector<8x1xf32> to vector<8x256xf32>
    %26 = vector.broadcast %24 : vector<1x256xf32> to vector<8x256xf32>
    %27 = arith.mulf %25, %26 : vector<8x256xf32>
    %28 = arith.addf %22, %27 : vector<8x256xf32>
    %29 = vector.extract_strided_slice %1 {offsets = [0, 4], sizes = [8, 1], strides = [1, 1]} : vector<8x8xf32> to vector<8x1xf32>
    %30 = vector.extract_strided_slice %0 {offsets = [4, 0], sizes = [1, 256], strides = [1, 1]} : vector<8x256xf32> to vector<1x256xf32>
    %31 = vector.broadcast %29 : vector<8x1xf32> to vector<8x256xf32>
    %32 = vector.broadcast %30 : vector<1x256xf32> to vector<8x256xf32>
    %33 = arith.mulf %31, %32 : vector<8x256xf32>
    %34 = arith.addf %28, %33 : vector<8x256xf32>
    %35 = vector.extract_strided_slice %1 {offsets = [0, 5], sizes = [8, 1], strides = [1, 1]} : vector<8x8xf32> to vector<8x1xf32>
    %36 = vector.extract_strided_slice %0 {offsets = [5, 0], sizes = [1, 256], strides = [1, 1]} : vector<8x256xf32> to vector<1x256xf32>
    %37 = vector.broadcast %35 : vector<8x1xf32> to vector<8x256xf32>
    %38 = vector.broadcast %36 : vector<1x256xf32> to vector<8x256xf32>
    %39 = arith.mulf %37, %38 : vector<8x256xf32>
    %40 = arith.addf %34, %39 : vector<8x256xf32>
    %41 = vector.extract_strided_slice %1 {offsets = [0, 6], sizes = [8, 1], strides = [1, 1]} : vector<8x8xf32> to vector<8x1xf32>
    %42 = vector.extract_strided_slice %0 {offsets = [6, 0], sizes = [1, 256], strides = [1, 1]} : vector<8x256xf32> to vector<1x256xf32>
    %43 = vector.broadcast %41 : vector<8x1xf32> to vector<8x256xf32>
    %44 = vector.broadcast %42 : vector<1x256xf32> to vector<8x256xf32>
    %45 = arith.mulf %43, %44 : vector<8x256xf32>
    %46 = arith.addf %40, %45 : vector<8x256xf32>
    %47 = vector.extract_strided_slice %1 {offsets = [0, 7], sizes = [8, 1], strides = [1, 1]} : vector<8x8xf32> to vector<8x1xf32>
    %48 = vector.extract_strided_slice %0 {offsets = [7, 0], sizes = [1, 256], strides = [1, 1]} : vector<8x256xf32> to vector<1x256xf32>
    %49 = vector.broadcast %47 : vector<8x1xf32> to vector<8x256xf32>
    %50 = vector.broadcast %48 : vector<1x256xf32> to vector<8x256xf32>
    %51 = arith.mulf %49, %50 : vector<8x256xf32>
    %52 = arith.addf %46, %51 : vector<8x256xf32>
    %c0_5 = arith.constant 0 : index
    %c0_6 = arith.constant 0 : index
    %53 = vector.load %arg3[%c0_5, %c0_6] : memref<8x256xf32, #tpu.memory_space<vmem>>, vector<8x256xf32>
    tpu.vector_store %arg3[%c0_5, %c0_6], %52 {strides = array<i32>} : memref<8x256xf32, #tpu.memory_space<vmem>>, vector<8x256xf32>,
    return
  }
}

</mosaic_0001>

<bundles_post_ra>
// kernel: tpu_custom_call.1
= control target key start
LH: loop header
LB: loop body
LE: loop exit
PB: predicated region body
PF: predicated region fallthrough
CT: control target
= control target key end

     0   :  { %8 = vsyncpa [#allocation3], 0  ;;  %s253_s0 = inlined_call_operand.hbm [shape: f32[8,256], index: 0, kind: input, shape index: {}]   ;;  %s254_s1 = inlined_call_operand.vmem [shape: f32[8,8], index: 1, kind: input, shape index: {}]   ;;  %s255_s2 = inlined_call_operand.vmem [shape: f32[8,1], index: 2, kind: input, shape index: {}]   ;;  %s256_s3 = inlined_call_operand.hbm [shape: f32[8,256], index: 3, kind: output, shape index: {}]  }
   0x1   :  { %9 = vsyncpa [#allocation4], 0  ;;  %s15_s14 = sshll.u32 %s253_s0, 4  ;;  %s211_s15 = smov [#allocation2]   ;;  %s16_s14 = int_to_ptr.hbm [resolvable:$true] %s15_s14 }
   0x2   :  { %s17_s16 = sshll.u32 %s211_s15, 4  ;;  %s18_s16 = int_to_ptr.vmem [resolvable:$true] %s17_s16 }
   0x3   :  { %20 = dma.hbm_to_vmem [thread:$0]  %s16_s14, 256, %s18_s16, [#allocation3]  }
   0x4   :  { %207 = dma.done.wait [#allocation3], 256  }
   0x5   :  { %208 = vsyncadd [#allocation3], 4294967040  ;;  %v212_v0 = vmov 0   ;;  %v213_v1 = vmov 1   ;;  %v214_v2 = vmov 3   ;;  %v32_v3 = vld [vmem:[%s255_s2] sm:$0xff] }
   0x6   :  { %150 = vset.pattern.permute.xlu0 %v212_v0  ;;  %151 = vset.pattern.permute.xlu1 %v213_v1  ;;  %v31_v4 = vld [vmem:[%s254_s1] sm:$0xff]  ;;  %v215_v5 = vmov 2   ;;  %v216_v6 = vmov 4   ;;  %v217_v7 = vmov 5   ;;  %v218_v8 = vmov 6   ;;  %v30_v14 = vld [vmem:[#allocation2 + $0x8] sm:$0xff] }
   0x7   :  { %153 = vset.pattern.permute.xlu2 %v214_v2  ;;  %35 = vperm.xlu0 %150, %v32_v3   ;;  %v219_v9 = vmov 7   ;;  %v29_v13 = vld [vmem:[#allocation2] sm:$0xff]  ;;  %v46_v16 = vperm.slane %v30_v14, 0  ;;  %v56_v18 = vperm.slane %v30_v14, 1  ;;  %v66_v20 = vperm.slane %v30_v14, 2  ;;  %s220_s0 = smov [#allocation5]  }
   0x8   :  { %52 = vperm.xlu1 %151, %v31_v4   ;;  %72 = vperm.xlu2 %153, %v31_v4   ;;  %v45_v15 = vperm.slane %v29_v13, 0  ;;  %v55_v17 = vperm.slane %v29_v13, 1  ;;  %v65_v19 = vperm.slane %v29_v13, 2  ;;  %v75_v30 = vperm.slane %v29_v13, 3  ;;  %s128_s1 = sshll.u32 %s220_s0, 4  ;;  %s130_s22 = sshll.u32 %s256_s3, 4  ;;  %s129_s1 = int_to_ptr.vmem [resolvable:$true] %s128_s1  ;;  %s131_s22 = int_to_ptr.hbm [resolvable:$true] %s130_s22 }
   0x9   :  { %v76_v31 = vperm.slane %v30_v14, 3  ;;  %v85_v36 = vperm.slane %v29_v13, 4  ;;  %v86_v37 = vperm.slane %v30_v14, 4  ;;  %v95_v42 = vperm.slane %v29_v13, 5 }
   0xa   :  { %v96_v43 = vperm.slane %v30_v14, 5  ;;  %v105_v46 = vperm.slane %v29_v13, 6  ;;  %v106_v47 = vperm.slane %v30_v14, 6  ;;  %v115_v53 = vperm.slane %v29_v13, 7 }
   0xb   :  { %v116_v54 = vperm.slane %v30_v14, 7 }
   0xf   :  { %42 = vperm.xlu0 %150, %v31_v4  }
  0x10   :  { %152 = vset.pattern.permute.xlu1 %v215_v5  ;;  %154 = vset.pattern.permute.xlu2 %v216_v6 }
  0x11   :  { %62 = vperm.xlu1 %152, %v31_v4   ;;  %82 = vperm.xlu2 %154, %v31_v4  }
  0x17   :  { %155 = vset.pattern.permute.xlu0 %v217_v7 }
  0x18   :  { %92 = vperm.xlu0 %155, %v31_v4  }
  0x19   :  { %156 = vset.pattern.permute.xlu1 %v218_v8  ;;  %157 = vset.pattern.permute.xlu2 %v219_v9 }
  0x1a   :  { %102 = vperm.xlu1 %156, %v31_v4   ;;  %112 = vperm.xlu2 %157, %v31_v4  }
  0x20   :  { %158 = vset.pattern.permute.xlu0 %v219_v9 }
  0x62   :  { %v73_v10 = vpop.permute.xlu2 %72 }
  0x63   :  { %v77_v40 = vmul.f32 %v75_v30, %v73_v10  ;;  %v78_v41 = vmul.f32 %v76_v31, %v73_v10 }
  0x6b   :  { %v83_v22 = vpop.permute.xlu2 %82 }
  0x6c   :  { %v87_v48 = vmul.f32 %v85_v36, %v83_v22  ;;  %v88_v49 = vmul.f32 %v86_v37, %v83_v22 }
  0x74   :  { %v113_v58 = vpop.permute.xlu2 %112 }
  0x75   :  { %v117_v1 = vmul.f32 %v115_v53, %v113_v58  ;;  %v118_v2 = vmul.f32 %v116_v54, %v113_v58 }
  0x79   :  { %v36_v11 = vpop.permute.xlu0 %35 }
  0x7a   :  { %v53_v12 = vpop.permute.xlu1 %52  ;;  %v38_v23 = vadd.f32 %v36_v11, %v29_v13  ;;  %v39_v24 = vadd.f32 %v36_v11, %v30_v14 }
  0x7b   :  { %v57_v28 = vmul.f32 %v55_v17, %v53_v12  ;;  %v58_v29 = vmul.f32 %v56_v18, %v53_v12 }
  0x81   :  { %v43_v21 = vpop.permute.xlu0 %42 }
  0x82   :  { %v47_v25 = vmul.f32 %v45_v15, %v43_v21  ;;  %v48_v26 = vmul.f32 %v46_v16, %v43_v21 }
  0x83   :  { %v63_v27 = vpop.permute.xlu1 %62 }
  0x84   :  { %v49_v32 = vadd.f32 %v47_v25, %v38_v23  ;;  %v50_v33 = vadd.f32 %v48_v26, %v39_v24  ;;  %v67_v34 = vmul.f32 %v65_v19, %v63_v27  ;;  %v68_v35 = vmul.f32 %v66_v20, %v63_v27 }
  0x86   :  { %v59_v38 = vadd.f32 %v57_v28, %v49_v32  ;;  %v60_v39 = vadd.f32 %v58_v29, %v50_v33 }
  0x88   :  { %v69_v44 = vadd.f32 %v67_v34, %v59_v38  ;;  %v70_v45 = vadd.f32 %v68_v35, %v60_v39 }
  0x8a   :  { %v79_v50 = vadd.f32 %v77_v40, %v69_v44  ;;  %v80_v51 = vadd.f32 %v78_v41, %v70_v45  ;;  %v93_v52 = vpop.permute.xlu0 %92 }
  0x8b   :  { %v97_v55 = vmul.f32 %v95_v42, %v93_v52  ;;  %v98_v56 = vmul.f32 %v96_v43, %v93_v52 }
  0x8c   :  { %v103_v57 = vpop.permute.xlu1 %102  ;;  %v89_v59 = vadd.f32 %v87_v48, %v79_v50  ;;  %v90_v60 = vadd.f32 %v88_v49, %v80_v51 }
  0x8d   :  { %v107_v61 = vmul.f32 %v105_v46, %v103_v57  ;;  %v108_v62 = vmul.f32 %v106_v47, %v103_v57 }
  0x8e   :  { %v99_v63 = vadd.f32 %v97_v55, %v89_v59  ;;  %v100_v0 = vadd.f32 %v98_v56, %v90_v60 }
  0x90   :  { %v109_v3 = vadd.f32 %v107_v61, %v99_v63  ;;  %v110_v4 = vadd.f32 %v108_v62, %v100_v0 }
  0x92   :  { %v119_v5 = vadd.f32 %v117_v1, %v109_v3  ;;  %v120_v6 = vadd.f32 %v118_v2, %v110_v4 }
  0x94   :  { %121 = vst [vmem:[#allocation5] sm:$0xff] %v119_v5 }
  0x95   :  { %122 = vst [vmem:[#allocation5 + $0x8] sm:$0xff] %v120_v6 }
  0x96   :  { %133 = dma.vmem_to_hbm [thread:$0]  %s129_s1, 256, %s131_s22, [#allocation4]  }
  0x97   :  { %209 = dma.done.wait [#allocation4], 256  }
  0x98   :  { %210 = vsyncadd [#allocation4], 4294967040 }
  0x99   :  { %138 = vsyncpa [#allocation3], 1 }
  0x9a   :  { %139 = vsyncpa [#allocation4], 1 }

</bundles_post_ra>
